<compile_context>
chip_gen: v7x
topology: tpu7x:2x2x1
jax: 0.10.0
libtpu: 0.0.40
codegen_flags: <defaults>
</compile_context>

<pallas_src>
import functools

import jax
import jax.numpy as jnp
from jax.experimental import pallas as pl
from jax.experimental.pallas import tpu as pltpu

_LANE = 128           # TPU vreg lane width (last dim tile)
_MAX_HW_TILE = 2048   # fallback lane-axis tile target (>=512 -> ~85% HBM roofline)


def _sublane_tile(dtype) -> int:
    # Sublane tile height: 8 for 32-bit, 16 for 16-bit, 32 for 8-bit dtypes.
    return (8 * 4) // jnp.dtype(dtype).itemsize


def _pick_hw_tile(hw: int) -> int:
    """Pick a lane-axis tile for the fallback: full dim if small, else a
    multiple-of-128 divisor of hw (keeps blocks (8,128)-legal and unragged)."""
    if hw <= _MAX_HW_TILE:
        return hw
    for t in (2048, 1024, 512, 256, 128):
        if hw % t == 0:
            return t
    # TODO(synk): ragged hw > 2048 with no 128-multiple divisor -> whole-row
    # blocks; could instead use a cdiv grid with a masked last block.
    return hw


# ---------------------------------------------------------------------------
# Kernels
# ---------------------------------------------------------------------------

def _concat_dma_flat_kernel(x_hbm, y_hbm, o_hbm, sem, *, cx_flat):
    # x_hbm: (N, Cx*H*W), y_hbm: (N, Cy*H*W), o_hbm: (N, (Cx+Cy)*H*W), all HBM.
    cp_x = pltpu.make_async_copy(x_hbm, o_hbm.at[:, :cx_flat], sem.at[0])
    cp_y = pltpu.make_async_copy(y_hbm, o_hbm.at[:, cx_flat:], sem.at[1])
    cp_x.start()
    cp_y.start()
    # TODO(synk): on v7x (3.2 TB/s HBM) try splitting each copy into 2-4 chunk
    # DMAs along N (start all, then wait) to recover the last 10-20% of
    # read+write bandwidth; measure (3 runs, min) and revert if neutral.
    cp_x.wait()
    cp_y.wait()


def _concat_dma_chan_kernel(x_hbm, y_hbm, o_hbm, sem, *, cx):
    # x_hbm: (N, Cx, HW), y_hbm: (N, Cy, HW), o_hbm: (N, Cx+Cy, HW), all HBM.
    cp_x = pltpu.make_async_copy(x_hbm, o_hbm.at[:, :cx, :], sem.at[0])
    cp_y = pltpu.make_async_copy(y_hbm, o_hbm.at[:, cx:, :], sem.at[1])
    cp_x.start()
    cp_y.start()
    cp_x.wait()
    cp_y.wait()


def _concat_vmem_kernel(x_ref, y_ref, o_ref, *, cx):
    # x_ref: (1, Cx, thw), y_ref: (1, Cy, thw), o_ref: (1, Cx+Cy, thw)
    # Lane-dense (H*W last) layout -> unmasked, full-width vector stores.
    o_ref[:, :cx, :] = x_ref[...]
    o_ref[:, cx:, :] = y_ref[...]


# ---------------------------------------------------------------------------
# Wrapper
# ---------------------------------------------------------------------------

def concat_channels(x: jax.Array, y: jax.Array) -> jax.Array:
    """torch.cat((x, y), dim=1) for NCHW tensors via Pallas TPU kernels."""
    assert x.ndim == 4 and y.ndim == 4
    n, cx, h, w = x.shape
    ny, cy, hy, wy = y.shape
    assert (n, h, w) == (ny, hy, wy), "non-concat dims must match"
    assert x.dtype == y.dtype
    cout = cx + cy
    hw = h * w
    cx_flat, cy_flat = cx * hw, cy * hw
    out_flat = cout * hw
    itemsize = jnp.dtype(x.dtype).itemsize

    # Pure HBM copy: read x+y once, write x+y once.
    bytes_moved = 2 * (x.size + y.size) * itemsize
    cost = pl.CostEstimate(flops=0, transcendentals=0, bytes_accessed=bytes_moved)

    # ---- Fast path 1: seam 128-lane aligned in the flat view ---------------
    if cx_flat % _LANE == 0:
        x2 = x.reshape(n, cx_flat)
        y2 = y.reshape(n, cy_flat)
        out2 = pl.pallas_call(
            functools.partial(_concat_dma_flat_kernel, cx_flat=cx_flat),
            out_shape=jax.ShapeDtypeStruct((n, out_flat), x.dtype),
            in_specs=[
                pl.BlockSpec(memory_space=pl.ANY),
                pl.BlockSpec(memory_space=pl.ANY),
            ],
            out_specs=pl.BlockSpec(memory_space=pl.ANY),
            scratch_shapes=[pltpu.SemaphoreType.DMA((2,))],
            cost_estimate=cost,
        )(x2, y2)
        return out2.reshape(n, cout, h, w)

    # ---- Fast path 2: seam sublane-tile aligned along C --------------------
    if cx % _sublane_tile(x.dtype) == 0:
        x3 = x.reshape(n, cx, hw)
        y3 = y.reshape(n, cy, hw)
        out3 = pl.pallas_call(
            functools.partial(_concat_dma_chan_kernel, cx=cx),
            out_shape=jax.ShapeDtypeStruct((n, cout, hw), x.dtype),
            in_specs=[
                pl.BlockSpec(memory_space=pl.ANY),
                pl.BlockSpec(memory_space=pl.ANY),
            ],
            out_specs=pl.BlockSpec(memory_space=pl.ANY),
            scratch_shapes=[pltpu.SemaphoreType.DMA((2,))],
            cost_estimate=cost,
        )(x3, y3)
        return out3.reshape(n, cout, h, w)

    # ---- Fallback: lane-dense VMEM copy, tiled along H*W -------------------
    thw = _pick_hw_tile(hw)
    grid = (n, hw // thw)
    bytes_per_step = (cx + cy + cout) * thw * itemsize
    # 2x for double-buffering, small headroom; clamp to v7x's 64 MiB physical.
    vmem_limit = int(min(64 << 20, max(32 << 20, 4 * bytes_per_step)))

    x3 = x.reshape(n, cx, hw)
    y3 = y.reshape(n, cy, hw)
    out3 = pl.pallas_call(
        functools.partial(_concat_vmem_kernel, cx=cx),
        out_shape=jax.ShapeDtypeStruct((n, cout, hw), x.dtype),
        grid_spec=pltpu.PrefetchScalarGridSpec(
            num_scalar_prefetch=0,
            grid=grid,
            in_specs=[
                pl.BlockSpec((1, cx, thw), lambda b, s: (b, 0, s)),
                pl.BlockSpec((1, cy, thw), lambda b, s: (b, 0, s)),
            ],
            out_specs=pl.BlockSpec((1, cout, thw), lambda b, s: (b, 0, s)),
        ),
        compiler_params=pltpu.CompilerParams(
            dimension_semantics=("parallel", "parallel"),
            vmem_limit_bytes=vmem_limit,
        ),
        cost_estimate=cost,
    )(x3, y3)
    return out3.reshape(n, cout, h, w)


# ---------------------------------------------------------------------------
# Demo / self-check
# ---------------------------------------------------------------------------

if __name__ == "__main__":
    key = jax.random.PRNGKey(0)
    k1, k2, k3, k4, k5, k6 = jax.random.split(key, 6)

    # Primary shapes (hit fast path 1: Cx*H*W = 1024 is 128-aligned).
    x = jax.random.normal(k1, (2, 4, 16, 16), dtype=jnp.float32)
    y = jax.random.normal(k2, (2, 6, 16, 16), dtype=jnp.float32)
    out = jax.block_until_ready(concat_channels(x, y))
    ref = jnp.concatenate((x, y), axis=1)
    assert out.shape == (2, 10, 16, 16) and out.dtype == x.dtype
    assert jnp.array_equal(out, ref), "fast path 1 mismatch"

    # Channel-aligned DMA path (Cx*H*W = 200 not 128-aligned, but Cx=8 is
    # sublane-tile aligned for f32).
    xa = jax.random.normal(k3, (2, 8, 5, 5), dtype=jnp.float32)
    ya = jax.random.normal(k4, (2, 4, 5, 5), dtype=jnp.float32)
    outa = jax.block_until_ready(concat_channels(xa, ya))
    assert jnp.array_equal(outa, jnp.concatenate((xa, ya), axis=1)), \
        "fast path 2 mismatch"

    # Fallback path (Cx=3: neither 128-lane nor sublane aligned).
    xb = jax.random.normal(k5, (2, 3, 5, 5), dtype=jnp.float32)
    yb = jax.random.normal(k6, (2, 5, 5, 5), dtype=jnp.float32)
    outb = jax.block_until_ready(concat_channels(xb, yb))
    assert jnp.array_equal(outb, jnp.concatenate((xb, yb), axis=1)), \
        "fallback mismatch"

    print("KERNEL_OK")
</pallas_src>

<mosaic_0001>
module attributes {stable_mosaic.version = 11 : i64} {
  func.func @_concat_dma_flat_kernel(%arg0: memref<2x1024xf32, #tpu.memory_space<any>>, %arg1: memref<2x1536xf32, #tpu.memory_space<any>>, %arg2: memref<2x2560xf32, #tpu.memory_space<any>>, %arg3: memref<2x!tpu.dma_semaphore, #tpu.memory_space<semaphore_mem>>) attributes {dimension_semantics = [], scalar_prefetch = 0 : i64, scratch_operands = 1 : i64, tpu.core_type = #tpu.core_type<tc>} {
    %c0_i32 = arith.constant 0 : i32
    %c0_i32_0 = arith.constant 0 : i32
    %c0_i32_1 = arith.constant 0 : i32
    %0 = tpu.memref_slice %arg2[%c0_i32_0, %c0_i32_1] : memref<2x2560xf32, #tpu.memory_space<any>> -> memref<2x1024xf32, #tpu.memory_space<any>>
    %1 = tpu.memref_slice %arg3[%c0_i32] : memref<2x!tpu.dma_semaphore, #tpu.memory_space<semaphore_mem>> -> memref<1x!tpu.dma_semaphore, #tpu.memory_space<semaphore_mem>>
    %2 = tpu.memref_squeeze %1 : memref<1x!tpu.dma_semaphore, #tpu.memory_space<semaphore_mem>> -> memref<!tpu.dma_semaphore, #tpu.memory_space<semaphore_mem>>
    tpu.enqueue_dma source(%arg0 : memref<2x1024xf32, #tpu.memory_space<any>>) target(%0 : memref<2x1024xf32, #tpu.memory_space<any>>) target_semaphore(%2 : memref<!tpu.dma_semaphore, #tpu.memory_space<semaphore_mem>>)
    %c1_i32 = arith.constant 1 : i32
    %c0_i32_2 = arith.constant 0 : i32
    %c1024_i32 = arith.constant 1024 : i32
    %3 = tpu.memref_slice %arg2[%c0_i32_2, %c1024_i32] : memref<2x2560xf32, #tpu.memory_space<any>> -> memref<2x1536xf32, #tpu.memory_space<any>>
    %4 = tpu.memref_slice %arg3[%c1_i32] : memref<2x!tpu.dma_semaphore, #tpu.memory_space<semaphore_mem>> -> memref<1x!tpu.dma_semaphore, #tpu.memory_space<semaphore_mem>>
    %5 = tpu.memref_squeeze %4 : memref<1x!tpu.dma_semaphore, #tpu.memory_space<semaphore_mem>> -> memref<!tpu.dma_semaphore, #tpu.memory_space<semaphore_mem>>
    tpu.enqueue_dma source(%arg1 : memref<2x1536xf32, #tpu.memory_space<any>>) target(%3 : memref<2x1536xf32, #tpu.memory_space<any>>) target_semaphore(%5 : memref<!tpu.dma_semaphore, #tpu.memory_space<semaphore_mem>>)
    %c0_i32_3 = arith.constant 0 : i32
    %c0_i32_4 = arith.constant 0 : i32
    %c0_i32_5 = arith.constant 0 : i32
    %6 = tpu.memref_slice %arg2[%c0_i32_4, %c0_i32_5] : memref<2x2560xf32, #tpu.memory_space<any>> -> memref<2x1024xf32, #tpu.memory_space<any>>
    %7 = tpu.memref_slice %arg3[%c0_i32_3] : memref<2x!tpu.dma_semaphore, #tpu.memory_space<semaphore_mem>> -> memref<1x!tpu.dma_semaphore, #tpu.memory_space<semaphore_mem>>
    %8 = tpu.memref_squeeze %7 : memref<1x!tpu.dma_semaphore, #tpu.memory_space<semaphore_mem>> -> memref<!tpu.dma_semaphore, #tpu.memory_space<semaphore_mem>>
    tpu.wait_dma2 semaphore(%8 : memref<!tpu.dma_semaphore, #tpu.memory_space<semaphore_mem>>) src(%arg0 : memref<2x1024xf32, #tpu.memory_space<any>>) dst(%6 : memref<2x1024xf32, #tpu.memory_space<any>>)
    %c1_i32_6 = arith.constant 1 : i32
    %c0_i32_7 = arith.constant 0 : i32
    %c1024_i32_8 = arith.constant 1024 : i32
    %9 = tpu.memref_slice %arg2[%c0_i32_7, %c1024_i32_8] : memref<2x2560xf32, #tpu.memory_space<any>> -> memref<2x1536xf32, #tpu.memory_space<any>>
    %10 = tpu.memref_slice %arg3[%c1_i32_6] : memref<2x!tpu.dma_semaphore, #tpu.memory_space<semaphore_mem>> -> memref<1x!tpu.dma_semaphore, #tpu.memory_space<semaphore_mem>>
    %11 = tpu.memref_squeeze %10 : memref<1x!tpu.dma_semaphore, #tpu.memory_space<semaphore_mem>> -> memref<!tpu.dma_semaphore, #tpu.memory_space<semaphore_mem>>
    tpu.wait_dma2 semaphore(%11 : memref<!tpu.dma_semaphore, #tpu.memory_space<semaphore_mem>>) src(%arg1 : memref<2x1536xf32, #tpu.memory_space<any>>) dst(%9 : memref<2x1536xf32, #tpu.memory_space<any>>)
    return
  }
}

</mosaic_0001>

<bundles_post_ra>
// kernel: tpu_custom_call.1
= control target key start
LH: loop header
LB: loop body
LE: loop exit
PB: predicated region body
PF: predicated region fallthrough
CT: control target
= control target key end

     0   :  { %s66_s12 = smov [#allocation2]   ;;  %s67_s13 = smov [#allocation3]   ;;  %s98_s0 = inlined_call_operand.hbm [shape: f32[2,1024], index: 0, kind: input, shape index: {}]   ;;  %s99_s2 = inlined_call_operand.hbm [shape: f32[2,2560], index: 2, kind: output, shape index: {}]   ;;  %s100_s1 = inlined_call_operand.hbm [shape: f32[2,1536], index: 1, kind: input, shape index: {}]  }
   0x1   :  { %s20_s11 = scalar_lea.hbm %s99_s2, 256  ;;  %s68_s14 = smov 0  }
   0x2   :  { %19 = dma.general %s98_s0, 256, %s99_s2, %s66_s12, %s67_s13, [#allocation4], %s68_s14, 0  }
   0x3   :  { %s69_s19 = smov [#allocation2 + $0x1]   ;;  %s70_s20 = smov [#allocation5]  }
   0x4   :  { %34 = dma.general %s100_s1, 384, %s20_s11, %s69_s19, %s70_s20, [#allocation6], %s68_s14, 0  }
   0x5   :  { %62 = dma.done.wait [#allocation2], 256 }
   0x6   :  { %63 = vsyncadd [#allocation2], 4294967040 }
   0x7   :  { %64 = dma.done.wait [#allocation2 + $0x1], 384 }
   0x8   :  { %65 = vsyncadd [#allocation2 + $0x1], 4294966912 }
   0x9   :  { %42 = vsyncmov [#allocation2] }
   0xc   :  { %s43_s23 = vpop.sfrf %42 }
   0xd   :  { %p55_p0 = scmp.ne.s32.totalorder %s43_s23, 0 }
   0xf   :  { %47 = shalt.err (%p55_p0)  }
  0x10   :  { %49 = vsyncmov [#allocation2 + $0x1] }
  0x13   :  { %s50_s24 = vpop.sfrf %49 }
  0x14   :  { %p56_p1 = scmp.ne.s32.totalorder %s50_s24, 0 }
  0x16   :  { %54 = shalt.err (%p56_p1)  }

</bundles_post_ra>
